<compile_context>
chip_gen: v7x
topology: tpu7x:2x2x1
jax: 0.10.0
libtpu: 0.0.40
codegen_flags: <defaults>
</compile_context>

<pallas_src>
import functools
from typing import NamedTuple, Tuple

import jax
import jax.numpy as jnp
from jax.experimental import pallas as pl
from jax.experimental.pallas import tpu as pltpu


def _round_up(x: int, m: int) -> int:
    return ((x + m - 1) // m) * m


def _pick_tile_m(Mp: int) -> int:
    """Batch tile: >=2 grid steps once Mp >= 16 (v7x megacore), cap at 512."""
    if Mp <= 8:
        return Mp
    tile = min(512, Mp // 2)
    tile = max(8, (tile // 8) * 8)
    while Mp % tile:          # Mp is a multiple of 8, so this terminates at 8
        tile -= 8
    return tile


# ---------------------------------------------------------------------------
# Kernel body: fused matmul + bias + ReLU chain, everything resident in VMEM.
# refs = (x, w0, b0, w1, b1, ..., out); weights pre-transposed to (in, out).
# ---------------------------------------------------------------------------
def _mlp_kernel(*refs, num_layers: int):
    x_ref = refs[0]
    o_ref = refs[-1]
    param_refs = refs[1:-1]

    h = x_ref[...].astype(jnp.float32)
    for l in range(num_layers):
        w = param_refs[2 * l][...]          # (Kp, Np), f32 or bf16
        b = param_refs[2 * l + 1][...]      # (1, Np),  f32
        # MXU matmul: cast the activation to the weight dtype (bf16 fast path
        # on v6e/v7x), always accumulate in f32; bias-add/ReLU stay f32 so the
        # VPU path is cheap on v5e too.
        h = jnp.dot(h.astype(w.dtype), w, preferred_element_type=jnp.float32) + b
        if l < num_layers - 1:
            h = jnp.maximum(h, 0.0)
    o_ref[...] = h.astype(o_ref.dtype)


# ---------------------------------------------------------------------------
# One-time, host-side parameter packing (hoisted out of the forward path).
# ---------------------------------------------------------------------------
class PackedNet(NamedTuple):
    arrays: Tuple[jax.Array, ...]   # (wt0, b0, wt1, b1, ...)
    dims: Tuple[int, ...]           # logical feature sizes, incl. input
    pdims: Tuple[int, ...]          # 128-lane-padded feature sizes


def pack_params(params, in_features: int, weight_dtype=jnp.float32) -> PackedNet:
    """Transpose nn.Linear weights to (in, out) and zero-pad to 128 lanes, once."""
    dims = (in_features,) + tuple(w.shape[0] for (w, _) in params)
    pdims = tuple(_round_up(d, 128) for d in dims)
    arrays = []
    for l, (w, b) in enumerate(params):
        N, K = w.shape
        assert K == dims[l] and N == dims[l + 1]
        Kp, Np = pdims[l], pdims[l + 1]
        wt = jnp.zeros((Kp, Np), weight_dtype).at[:K, :N].set(w.T.astype(weight_dtype))
        bp = jnp.zeros((1, Np), jnp.float32).at[:, :N].set(
            b.astype(jnp.float32).reshape(1, N))
        arrays += [wt, bp]
    return PackedNet(tuple(arrays), dims, pdims)


# ---------------------------------------------------------------------------
# Forward pass: pad input -> single fused pallas_call -> slice output.
# Pad/slice are inside the jit so XLA fuses them with the kernel launch.
# ---------------------------------------------------------------------------
@functools.partial(jax.jit, static_argnums=(2, 3))
def _forward_impl(x, packed_arrays, dims, pdims):
    M, K0 = x.shape
    assert K0 == dims[0], "input feature dim mismatch"
    L = len(dims) - 1

    Mp = _round_up(M, 8)
    tile_m = _pick_tile_m(Mp)
    grid = (Mp // tile_m,)

    # Lane/sublane zero-pad of the input (fused by XLA inside this jit).
    xp = jnp.pad(x.astype(jnp.float32), ((0, Mp - M), (0, pdims[0] - K0)))

    in_specs = [pl.BlockSpec((tile_m, pdims[0]), lambda i: (i, 0))]
    for l in range(L):
        Kp, Np = pdims[l], pdims[l + 1]
        in_specs.append(pl.BlockSpec((Kp, Np), lambda i: (0, 0)))  # resident weight
        in_specs.append(pl.BlockSpec((1, Np), lambda i: (0, 0)))   # resident bias

    # --- VMEM guardrail (v7x: 64 MiB/TC physical, 32 MiB default scoped) ----
    param_bytes = sum(int(a.size) * a.dtype.itemsize for a in packed_arrays)
    io_bytes = (tile_m * pdims[0] + tile_m * pdims[-1]) * 4
    # x2: default pipelining double-buffers every input; + headroom for
    # in-flight activations / output buffers.
    vmem_budget = 2 * param_bytes + 2 * io_bytes + (2 << 20)
    assert vmem_budget <= (56 << 20), (
        "Resident-weight MLP no longer fits v7x VMEM; re-tile over K / layers "
        "(reduction axis last, 'arbitrary') instead of keeping all weights "
        "resident.")
    cp_kwargs = dict(dimension_semantics=("parallel",))
    if vmem_budget > (30 << 20):
        cp_kwargs["vmem_limit_bytes"] = min(int(vmem_budget), 60 << 20)

    # Advisory cost estimate over the *logical* (unpadded) problem.
    flops = sum(2 * M * dims[l] * dims[l + 1] for l in range(L))
    bytes_accessed = int(x.size * 4 + param_bytes + M * dims[-1] * 4)

    out_padded = pl.pallas_call(
        functools.partial(_mlp_kernel, num_layers=L),
        out_shape=jax.ShapeDtypeStruct((Mp, pdims[-1]), jnp.float32),
        grid=grid,
        in_specs=in_specs,
        out_specs=pl.BlockSpec((tile_m, pdims[-1]), lambda i: (i, 0)),
        compiler_params=pltpu.CompilerParams(**cp_kwargs),
        cost_estimate=pl.CostEstimate(
            flops=flops, transcendentals=0, bytes_accessed=bytes_accessed),
    )(xp, *packed_arrays)

    # Slice away lane/sublane padding (fused into the same jit).
    return out_padded[:M, :dims[-1]]


def net_forward(x, packed: PackedNet):
    """Forward pass of Net using the one-time packed parameters."""
    return _forward_impl(x, packed.arrays, packed.dims, packed.pdims)


def init_params(layers, key):
    """Matches nn.Linear's default U(-1/sqrt(fan_in), +1/sqrt(fan_in)) init."""
    params = []
    for in_size, out_size in zip(layers, layers[1:]):
        key, kw, kb = jax.random.split(key, 3)
        bound = 1.0 / jnp.sqrt(jnp.float32(in_size))
        w = jax.random.uniform(kw, (out_size, in_size), jnp.float32,
                               minval=-bound, maxval=bound)
        b = jax.random.uniform(kb, (out_size,), jnp.float32,
                               minval=-bound, maxval=bound)
        params.append((w, b))
    return params


if __name__ == "__main__":
    key = jax.random.PRNGKey(0)

    # Small MLP consistent with the module: Layers = [in, hidden..., out]
    layers = [64, 128, 32, 16]
    batch = 16   # padded batch 16 -> 2 grid steps -> exercises megacore path

    key, kx = jax.random.split(key)
    x = jax.random.normal(kx, (batch, layers[0]), jnp.float32)
    params = init_params(layers, key)

    # Pure-JAX reference of the same forward semantics.
    ref = x
    for l, (w, b) in enumerate(params):
        ref = ref @ w.T + b
        if l < len(params) - 1:
            ref = jnp.maximum(ref, 0.0)

    # One-time packing (hoisted out of the per-call path), f32 path.
    packed_f32 = pack_params(params, layers[0], weight_dtype=jnp.float32)
    out = jax.block_until_ready(net_forward(x, packed_f32))
    assert out.shape == (batch, layers[-1])
    assert jnp.allclose(out, ref, atol=1e-4, rtol=1e-4)

    # bf16-weight MXU fast path (v6e/v7x native); f32 accumulation, looser tol.
    packed_bf16 = pack_params(params, layers[0], weight_dtype=jnp.bfloat16)
    out_bf16 = jax.block_until_ready(net_forward(x, packed_bf16))
    assert out_bf16.shape == (batch, layers[-1])
    assert jnp.allclose(out_bf16, ref, atol=1e-1, rtol=1e-1)

    print("KERNEL_OK")
</pallas_src>

<mosaic_0001>
module attributes {stable_mosaic.version = 11 : i64} {
  func.func @_mlp_kernel(%arg0: i32, %arg1: memref<8x128xf32, #tpu.memory_space<vmem>>, %arg2: memref<128x128xf32, #tpu.memory_space<vmem>>, %arg3: memref<1x128xf32, #tpu.memory_space<vmem>>, %arg4: memref<128x128xf32, #tpu.memory_space<vmem>>, %arg5: memref<1x128xf32, #tpu.memory_space<vmem>>, %arg6: memref<128x128xf32, #tpu.memory_space<vmem>>, %arg7: memref<1x128xf32, #tpu.memory_space<vmem>>, %arg8: memref<8x128xf32, #tpu.memory_space<vmem>>) attributes {dimension_semantics = [#tpu.dimension_semantics<parallel>], iteration_bounds = array<i64: 2>, scalar_prefetch = 0 : i64, scratch_operands = 0 : i64, tpu.core_type = #tpu.core_type<tc>, window_params = [{transform_indices = @transform_0, window_bounds = array<i64: 8, 128>}, {pipeline_mode = #tpu.pipeline_mode<synchronous>, transform_indices = @transform_1, window_bounds = array<i64: 128, 128>}, {pipeline_mode = #tpu.pipeline_mode<synchronous>, transform_indices = @transform_2, window_bounds = array<i64: 1, 128>}, {pipeline_mode = #tpu.pipeline_mode<synchronous>, transform_indices = @transform_3, window_bounds = array<i64: 128, 128>}, {pipeline_mode = #tpu.pipeline_mode<synchronous>, transform_indices = @transform_4, window_bounds = array<i64: 1, 128>}, {pipeline_mode = #tpu.pipeline_mode<synchronous>, transform_indices = @transform_5, window_bounds = array<i64: 128, 128>}, {pipeline_mode = #tpu.pipeline_mode<synchronous>, transform_indices = @transform_6, window_bounds = array<i64: 1, 128>}, {transform_indices = @transform_7, window_bounds = array<i64: 8, 128>}]} {
    %c0 = arith.constant 0 : index
    %c0_0 = arith.constant 0 : index
    %0 = vector.load %arg1[%c0, %c0_0] : memref<8x128xf32, #tpu.memory_space<vmem>>, vector<8x128xf32>
    %c0_1 = arith.constant 0 : index
    %c0_2 = arith.constant 0 : index
    %1 = vector.load %arg2[%c0_1, %c0_2] : memref<128x128xf32, #tpu.memory_space<vmem>>, vector<128x128xf32>
    %c0_3 = arith.constant 0 : index
    %c0_4 = arith.constant 0 : index
    %2 = vector.load %arg3[%c0_3, %c0_4] : memref<1x128xf32, #tpu.memory_space<vmem>>, vector<1x128xf32>
    %cst = arith.constant dense<0.000000e+00> : vector<8x128xf32>
    %3 = tpu.matmul %0, %1, %cst {dimension_numbers = #tpu.dot_dimension_numbers<[1], [0], [0], [1], [0, 0, 1, 1], [], []>} : vector<8x128xf32>, vector<128x128xf32>, vector<8x128xf32> -> vector<8x128xf32>
    %4 = vector.broadcast %2 : vector<1x128xf32> to vector<8x128xf32>
    %5 = arith.addf %3, %4 : vector<8x128xf32>
    %cst_5 = arith.constant 0.000000e+00 : f32
    %6 = vector.broadcast %cst_5 : f32 to vector<8x128xf32>
    %7 = arith.maximumf %5, %6 : vector<8x128xf32>
    %c0_6 = arith.constant 0 : index
    %c0_7 = arith.constant 0 : index
    %8 = vector.load %arg4[%c0_6, %c0_7] : memref<128x128xf32, #tpu.memory_space<vmem>>, vector<128x128xf32>
    %c0_8 = arith.constant 0 : index
    %c0_9 = arith.constant 0 : index
    %9 = vector.load %arg5[%c0_8, %c0_9] : memref<1x128xf32, #tpu.memory_space<vmem>>, vector<1x128xf32>
    %cst_10 = arith.constant dense<0.000000e+00> : vector<8x128xf32>
    %10 = tpu.matmul %7, %8, %cst_10 {dimension_numbers = #tpu.dot_dimension_numbers<[1], [0], [0], [1], [0, 0, 1, 1], [], []>} : vector<8x128xf32>, vector<128x128xf32>, vector<8x128xf32> -> vector<8x128xf32>
    %11 = vector.broadcast %9 : vector<1x128xf32> to vector<8x128xf32>
    %12 = arith.addf %10, %11 : vector<8x128xf32>
    %cst_11 = arith.constant 0.000000e+00 : f32
    %13 = vector.broadcast %cst_11 : f32 to vector<8x128xf32>
    %14 = arith.maximumf %12, %13 : vector<8x128xf32>
    %c0_12 = arith.constant 0 : index
    %c0_13 = arith.constant 0 : index
    %15 = vector.load %arg6[%c0_12, %c0_13] : memref<128x128xf32, #tpu.memory_space<vmem>>, vector<128x128xf32>
    %c0_14 = arith.constant 0 : index
    %c0_15 = arith.constant 0 : index
    %16 = vector.load %arg7[%c0_14, %c0_15] : memref<1x128xf32, #tpu.memory_space<vmem>>, vector<1x128xf32>
    %cst_16 = arith.constant dense<0.000000e+00> : vector<8x128xf32>
    %17 = tpu.matmul %14, %15, %cst_16 {dimension_numbers = #tpu.dot_dimension_numbers<[1], [0], [0], [1], [0, 0, 1, 1], [], []>} : vector<8x128xf32>, vector<128x128xf32>, vector<8x128xf32> -> vector<8x128xf32>
    %18 = vector.broadcast %16 : vector<1x128xf32> to vector<8x128xf32>
    %19 = arith.addf %17, %18 : vector<8x128xf32>
    %c0_17 = arith.constant 0 : index
    %c0_18 = arith.constant 0 : index
    %20 = vector.load %arg8[%c0_17, %c0_18] : memref<8x128xf32, #tpu.memory_space<vmem>>, vector<8x128xf32>
    tpu.vector_store %arg8[%c0_17, %c0_18], %19 {strides = array<i32>} : memref<8x128xf32, #tpu.memory_space<vmem>>, vector<8x128xf32>,
    return
  }
  func.func @transform_0(%arg0: i32) -> (i32, i32) {
    %c0_i32 = arith.constant 0 : i32
    %c0_i32_0 = arith.constant 0 : i32
    return %arg0, %c0_i32 : i32, i32
  }
  func.func @transform_1(%arg0: i32) -> (i32, i32) {
    %c0_i32 = arith.constant 0 : i32
    %c0_i32_0 = arith.constant 0 : i32
    %c0_i32_1 = arith.constant 0 : i32
    return %c0_i32, %c0_i32_0 : i32, i32
  }
  func.func @transform_2(%arg0: i32) -> (i32, i32) {
    %c0_i32 = arith.constant 0 : i32
    %c0_i32_0 = arith.constant 0 : i32
    %c0_i32_1 = arith.constant 0 : i32
    return %c0_i32, %c0_i32_0 : i32, i32
  }
  func.func @transform_3(%arg0: i32) -> (i32, i32) {
    %c0_i32 = arith.constant 0 : i32
    %c0_i32_0 = arith.constant 0 : i32
    %c0_i32_1 = arith.constant 0 : i32
    return %c0_i32, %c0_i32_0 : i32, i32
  }
  func.func @transform_4(%arg0: i32) -> (i32, i32) {
    %c0_i32 = arith.constant 0 : i32
    %c0_i32_0 = arith.constant 0 : i32
    %c0_i32_1 = arith.constant 0 : i32
    return %c0_i32, %c0_i32_0 : i32, i32
  }
  func.func @transform_5(%arg0: i32) -> (i32, i32) {
    %c0_i32 = arith.constant 0 : i32
    %c0_i32_0 = arith.constant 0 : i32
    %c0_i32_1 = arith.constant 0 : i32
    return %c0_i32, %c0_i32_0 : i32, i32
  }
  func.func @transform_6(%arg0: i32) -> (i32, i32) {
    %c0_i32 = arith.constant 0 : i32
    %c0_i32_0 = arith.constant 0 : i32
    %c0_i32_1 = arith.constant 0 : i32
    return %c0_i32, %c0_i32_0 : i32, i32
  }
  func.func @transform_7(%arg0: i32) -> (i32, i32) {
    %c0_i32 = arith.constant 0 : i32
    %c0_i32_0 = arith.constant 0 : i32
    return %arg0, %c0_i32 : i32, i32
  }
}

</mosaic_0001>

<bundles_post_ra>
// kernel: _forward_impl.1
= control target key start
LH: loop header
LB: loop body
LE: loop exit
PB: predicated region body
PF: predicated region fallthrough
CT: control target
= control target key end

     0   :  { %12 = vsyncpa [#allocation3], 0  ;;  %s1480_s0 = inlined_call_operand.vmem [shape: f32[16,128], index: 0, kind: input, shape index: {}]   ;;  %s1481_s1 = inlined_call_operand.hbm [shape: f32[128,128], index: 1, kind: input, shape index: {}]   ;;  %s1482_s2 = inlined_call_operand.vmem [shape: f32[1,128], index: 2, kind: input, shape index: {}]   ;;  %s1483_s3 = inlined_call_operand.hbm [shape: f32[128,128], index: 3, kind: input, shape index: {}]   ;;  %s1484_s4 = inlined_call_operand.vmem [shape: f32[1,128], index: 4, kind: input, shape index: {}]   ;;  %s1485_s5 = inlined_call_operand.hbm [shape: f32[128,128], index: 5, kind: input, shape index: {}]   ;;  %s1486_s6 = inlined_call_operand.vmem [shape: f32[1,128], index: 6, kind: input, shape index: {}]   ;;  %s1487_s7 = inlined_call_operand.hbm [shape: f32[16,128], index: 7, kind: output, shape index: {}]  }
   0x1   :  { %13 = vsyncpa [#allocation6], 0 }
   0x2   :  { %14 = vsyncpa [#allocation4], 0 }
   0x3   :  { %16 = vsyncpa [#allocation4 + $0x1], 0  ;;  %s1232_s24 = smov 0   ;;  %s1234_s25 = smov 0  }
   0x4   :  { %s1236_s26 = smov 0   ;;  %s1238_s27 = smov 0  }
   0x5 LB: > { %1494 = sst [smem:[#allocation12_spill]] %s1177_s26  ;;  %s1253_s28 = sadd.s32 4294967295, %s1181_s27   ;;  %s1181_s27 = sphi %s1238_s27, %s1509_s27   ;;  %s1177_s26 = sphi %s1236_s26, %s1511_s26   ;;  %s1173_s25 = sphi %s1234_s25, %s1513_s25   ;;  %s1169_s24 = sphi %s1232_s24, %s1512_s24  }
   0x6   : > { %s705_s29 = sadd.s32 4294967294, %s1181_s27   ;;  %s1257_s30 = sadd.s32 1, %s1181_s27  }
   0x7   : > { %1495 = sst [smem:[#allocation13_spill]] %s1257_s30  ;;  %s181_s8 = sadd.s32 1, %s1177_s26 }
   0x8   : > { %s178_s9 = ssub.s32 %s1181_s27, %s1257_s30  ;;  %p191_p0 = scmp.ne.s32.totalorder %s1177_s26, %s1173_s25 }
   0x9   : > { %p179_p1 = scmp.eq.s32.totalorder %s178_s9, 0  ;;  %p192_p2 = scmp.eq.s32.totalorder %s1253_s28, 1 }
   0xa   : > { %p197_p3 = scmp.ne.s32.totalorder %s1173_s25, %s1169_s24  ;;  %p198_p4 = scmp.eq.s32.totalorder %s705_s29, 1 }
   0xb   : > { %s1268_s10 = scalar_select %p179_p1, %s1177_s26, %s181_s8  }
   0xc   : > { %p1270_p5 = por %p192_p2, %p191_p0  ;;  %p1274_p6 = por %p198_p4, %p197_p3 }
   0xd   : > { %1496 = sst [smem:[#allocation14_spill]] %s1268_s10  ;;  %p706_p7 = scmp.ge.s32.totalorder %s1181_s27, 1 }
   0xe   : > { %s1497_s11 = scalar_select %p1270_p5, 1, 0 }
   0xf   : > { %s1498_s12 = scalar_select %p1274_p6, 1, 0 }
  0x10   : > { %p205_p8 = scmp.lt.s32.totalorder %s1181_s27, 3  ;;  %p1488_p9 = scmp.eq.s32.totalorder %s1253_s28, 0 }
  0x11   : > { %s1183_s14 = smov [#allocation5]   ;;  %s1184_s17 = smov [#allocation2]  }
  0x12   : > { %p1281_p10 = pnand %p706_p7, %p205_p8  ;;  %s233_s15 = sshll.u32 %s1183_s14, 4  ;;  %s1287_s15 = int_to_ptr.vmem [resolvable:$true] %s233_s15 }
  0x13   : > { %s217_s18 = sshll.u32 %s1184_s17, 4  ;;  %s1185_s19 = smov [#allocation7]   ;;  %s1295_s18 = int_to_ptr.vmem [resolvable:$true] %s217_s18 }
  0x14   : > { %s1499_s13 = scalar_select %p1281_p10, 1, 0 }
  0x15   : > { %p966_p11 = pneg %p1281_p10  ;;  %s1297_s20 = sshll.u32 %s1185_s19, 4  ;;  %s250_s20 = int_to_ptr.vmem [resolvable:$true] %s1297_s20 }
  0x16   : > { %s1027_s23 = scalar_lea.hbm %s1483_s3, 2048 }
  0x17   : > { %p1291_p12 = pnand %p1488_p9, %p966_p11  ;;  %p1028_p13 = scmp.ne.s32.totalorder %s1483_s3, %s1027_s23 }
  0x18   : > { %p1034_p3 = scmp.lt.u32.totalorder %s1027_s23, %s1483_s3 }
  0x19   : > { %p1307_p0 = pneg %p1291_p12 }
  0x1b   : > { %p1030_p1 = pnand %p1307_p0, %p1028_p13 }
  0x1d   : > { %p1031_p2 = pneg %p1030_p1 }
  0x1f   : > { %p1036_p4 = pnand %p1034_p3, %p1031_p2 }
  0x21   : > { %1039 = shalt.err (!%p1036_p4)
}
  0x22   : > { %s1040_s19 = scalar_lea.vmem %s1287_s15, 2048  ;;  %p1048_p9 = scmp.lt.s32.totalorder %s1287_s15, %s1287_s15 }
  0x23   : > { %p1041_p7 = scmp.ne.s32.totalorder %s1287_s15, %s1040_s19  ;;  %p1049_p6 = scmp.lt.s32.totalorder %s1040_s19, %s1040_s19 }
  0x25   : > { %p1043_p8 = pnand %p1041_p7, %p1307_p0  ;;  %p1050_p13 = por %p1049_p6, %p1048_p9 }
  0x27   : > { %p1044_p11 = pneg %p1043_p8 }
  0x29   : > { %p1051_p1 = pnand %p1050_p13, %p1044_p11 }
  0x2b   : > { %1054 = shalt.err (!%p1051_p1)
}
  0x2c   : > { %s1186_s21 = smov 128   ;;  %s1187_s22 = smov 8  }
  0x2d   : > { %972 = dma.hbm_to_vmem [thread:$0]  (!%p1291_p12), %s1483_s3, 2048, %s1287_s15, [#allocation6], %s1186_s21, %s1186_s21, %s1187_s22  }
  0x2e   : > { %s1055_s17 = scalar_lea.hbm %s1481_s1, 2048 }
  0x2f   : > { %p1056_p6 = scmp.ne.s32.totalorder %s1481_s1, %s1055_s17  ;;  %p1062_p3 = scmp.lt.u32.totalorder %s1055_s17, %s1481_s1 }
  0x31   : > { %p1058_p9 = pnand %p1056_p6, %p1307_p0 }
  0x33   : > { %p1059_p2 = pneg %p1058_p9 }
  0x35   : > { %p1064_p4 = pnand %p1062_p3, %p1059_p2 }
  0x37   : > { %1067 = shalt.err (!%p1064_p4)
}
  0x38   : > { %s1068_s15 = scalar_lea.vmem %s1295_s18, 2048  ;;  %p1076_p13 = scmp.lt.s32.totalorder %s1295_s18, %s1295_s18 }
  0x39   : > { %p1069_p7 = scmp.ne.s32.totalorder %s1295_s18, %s1068_s15  ;;  %p1077_p1 = scmp.lt.s32.totalorder %s1068_s15, %s1068_s15 }
  0x3b   : > { %p1071_p8 = pnand %p1069_p7, %p1307_p0  ;;  %p1078_p6 = por %p1077_p1, %p1076_p13 }
  0x3d   : > { %p1072_p11 = pneg %p1071_p8 }
  0x3f   : > { %p1079_p9 = pnand %p1078_p6, %p1072_p11 }
  0x41   : > { %1082 = shalt.err (!%p1079_p9)
}
  0x42   : > { %969 = dma.hbm_to_vmem [thread:$0]  (!%p1291_p12), %s1481_s1, 2048, %s1295_s18, [#allocation3], %s1186_s21, %s1186_s21, %s1187_s22  }
  0x43   : > { %s1083_s29 = scalar_lea.hbm %s1485_s5, 2048 }
  0x44   : > { %p1084_p2 = scmp.ne.s32.totalorder %s1485_s5, %s1083_s29  ;;  %p1090_p7 = scmp.lt.u32.totalorder %s1083_s29, %s1485_s5 }
  0x46   : > { %p1086_p3 = pnand %p1084_p2, %p1307_p0 }
  0x48   : > { %p1087_p4 = pneg %p1086_p3 }
  0x4a   : > { %p1092_p8 = pnand %p1090_p7, %p1087_p4 }
  0x4c   : > { %1095 = shalt.err (!%p1092_p8)
}
  0x4d   : > { %s1096_s15 = scalar_lea.vmem %s250_s20, 2048  ;;  %p1104_p6 = scmp.lt.s32.totalorder %s250_s20, %s250_s20 }
  0x4e   : > { %p1097_p11 = scmp.ne.s32.totalorder %s250_s20, %s1096_s15  ;;  %p1105_p9 = scmp.lt.s32.totalorder %s1096_s15, %s1096_s15 }
  0x50   : > { %p1099_p13 = pnand %p1097_p11, %p1307_p0  ;;  %p1106_p5 = por %p1105_p9, %p1104_p6 }
  0x52   : > { %p1100_p1 = pneg %p1099_p13 }
  0x54   : > { %p1107_p10 = pnand %p1106_p5, %p1100_p1 }
  0x56   : > { %1110 = shalt.err (!%p1107_p10)
}
  0x57   : > { %975 = dma.hbm_to_vmem [thread:$0]  (!%p1291_p12), %s1485_s5, 2048, %s250_s20, [#allocation6], %s1186_s21, %s1186_s21, %s1187_s22  }
  0x58   : > { %p1502_p2 = scmp.ne.s32.totalorder %s1499_s13, 0 }
  0x59   : > { %p1503_p0 = scmp.eq.s32.totalorder (!%p1502_p2), %s1253_s28, 0 }
  0x5a   : > { %275 = sbr.rel (%p1502_p2) target bundleno = 795 (0x31b), region = 48 }
  0x61   : > { %1156 = dma.done.wait (%p1503_p0), [#allocation3], 2048   ;;  %p1504_p3 = pmov %p1503_p0 }
  0x62   : > { %p1505_p5 = pmov %p1503_p0 }
  0x63   : > { %1158 = vsyncadd (%p1504_p3), [#allocation3], 4294965248 }
  0x64   : > { %1160 = dma.done.wait (%p1505_p5), [#allocation6], 4096   ;;  %p1506_p10 = pmov %p1503_p0 }
  0x65   : > { %v1188_v0 = vmov 0.0|0.0   ;;  %vm1189_vm0 = vmmov 0   ;;  %v1190_v1 = vmov 0.0   ;;  %v319_v2 = vld [vmem:[#allocation2] sm:$0xff]  ;;  %v320_v3 = vld [vmem:[#allocation2 + $0x8] sm:$0xff]  ;;  %v321_v4 = vld [vmem:[#allocation2 + $0x10] sm:$0xff] }
  0x66   : > { %1162 = vsyncadd (%p1506_p10), [#allocation6], 4294963200  ;;  %880 = vmatprep.subr.bf16.mxu0 %v1188_v0  ;;  %807 = vmatprep.mubr.msk.f32.mxu0 %vm1189_vm0, %v1190_v1  ;;  %v881_v5 = vpack.c.bf16 %v320_v3, %v319_v2  ;;  %v322_v6 = vld [vmem:[#allocation2 + $0x18] sm:$0xff]  ;;  %v323_v8 = vld [vmem:[#allocation2 + $0x20] sm:$0xff]  ;;  %p314_p12 = scmp.lt.s32.totalorder %s1253_s28, 1  ;;  %s311_s29 = sand.u32 1, %s1173_s25  }
  0x67   : > { %904 = vmatprep.subr.bf16.mxu1 %v1188_v0  ;;  %842 = vmatprep.mubr.msk.f32.mxu1 %vm1189_vm0, %v1190_v1  ;;  %v884_v7 = vpack.c.bf16 %v322_v6, %v321_v4  ;;  %v324_v9 = vld [vmem:[#allocation2 + $0x28] sm:$0xff]  ;;  %v413_v10 = vld [vmem:[#allocation5] sm:$0xff]  ;;  %v415_v12 = vld [vmem:[#allocation5 + $0x10] sm:$0xff]  ;;  %s715_s8 = sshll.u32 %s311_s29, 3  ;;  %s721_s19 = sshll.u32 %s1253_s28, 7 }
  0x68   : > { %882 = vmatpush3.bf16.msra.mxu0 %v881_v5  ;;  %v414_v11 = vld [vmem:[#allocation5 + $0x8] sm:$0xff]  ;;  %v416_v13 = vld [vmem:[#allocation5 + $0x18] sm:$0xff]  ;;  %v887_v14 = vpack.c.bf16 %v324_v9, %v323_v8  ;;  %v325_v16 = vld [vmem:[#allocation2 + $0x30] sm:$0xff]  ;;  %s315_s13 = scalar_select %p314_p12, %s1253_s28, 1 }
  0x69   : > { %883 = vmatprep.subr.bf16.mxu0 %v1188_v0  ;;  %v905_v15 = vpack.c.bf16 %v414_v11, %v413_v10  ;;  %v326_v17 = vld [vmem:[#allocation2 + $0x38] sm:$0xff]  ;;  %v908_v18 = vpack.c.bf16 %v416_v13, %v415_v12  ;;  %v417_v19 = vld [vmem:[#allocation5 + $0x20] sm:$0xff]  ;;  %v418_v20 = vld [vmem:[#allocation5 + $0x28] sm:$0xff]  ;;  %s313_s15 = scalar_lea.vmem [#allocation8], %s715_s8  ;;  %s602_s20 = scalar_lea.sflag [#allocation4], %s311_s29 }
  0x6a   : > { %v890_v21 = vpack.c.bf16 %v326_v17, %v325_v16  ;;  %v327_v22 = vld [vmem:[#allocation2 + $0x40] sm:$0xff]  ;;  %v328_v23 = vld [vmem:[#allocation2 + $0x48] sm:$0xff]  ;;  %v911_v24 = vpack.c.bf16 %v418_v20, %v417_v19  ;;  %v419_v25 = vld [vmem:[#allocation5 + $0x30] sm:$0xff]  ;;  %s716_s16 = sshll.u32 %s315_s13, 3  ;;  %s615_s18 = sshll.u32 %s313_s15, 4  ;;  %s1440_s18 = int_to_ptr.vmem [resolvable:$true] %s615_s18 }
  0x6b   : > { %906 = vmatpush3.bf16.msra.mxu1 %v905_v15  ;;  %v420_v26 = vld [vmem:[#allocation5 + $0x38] sm:$0xff]  ;;  %v893_v27 = vpack.c.bf16 %v328_v23, %v327_v22  ;;  %v329_v28 = vld [vmem:[#allocation2 + $0x50] sm:$0xff]  ;;  %v421_v31 = vld [vmem:[#allocation5 + $0x40] sm:$0xff]  ;;  %s317_s21 = scalar_lea.vmem %s1480_s0, %s716_s16  ;;  %s1438_s16 = scalar_lea.hbm %s1487_s7, %s721_s19 }
  0x6c   : > { %885 = vmatpush3.bf16.msra.mxu0 %v884_v7  ;;  %907 = vmatprep.subr.bf16.mxu1 %v1188_v0  ;;  %v330_v29 = vld [vmem:[#allocation2 + $0x58] sm:$0xff]  ;;  %v914_v30 = vpack.c.bf16 %v420_v26, %v419_v25  ;;  %v422_v32 = vld [vmem:[#allocation5 + $0x48] sm:$0xff]  ;;  %v331_v34 = vld [vmem:[#allocation2 + $0x60] sm:$0xff]  ;;  %s1111_s9 = scalar_lea.vmem %s1440_s18, 128  ;;  %p1507_p7 = scmp.ne.s32.totalorder %s1497_s11, 0 }
  0x6d   : > { %886 = vmatprep.subr.bf16.mxu0 %v1188_v0  ;;  %v896_v33 = vpack.c.bf16 %v330_v29, %v329_v28  ;;  %v332_v35 = vld [vmem:[#allocation2 + $0x68] sm:$0xff]  ;;  %v917_v36 = vpack.c.bf16 %v422_v32, %v421_v31  ;;  %v423_v37 = vld [vmem:[#allocation5 + $0x50] sm:$0xff]  ;;  %v424_v38 = vld [vmem:[#allocation5 + $0x58] sm:$0xff]  ;;  %p1112_p4 = scmp.ne.s32.totalorder %s1440_s18, %s1111_s9  ;;  %s1191_s28 = smov [#allocation8]  }
  0x6e   : > { %v899_v39 = vpack.c.bf16 %v332_v35, %v331_v34  ;;  %v333_v40 = vld [vmem:[#allocation2 + $0x70] sm:$0xff]  ;;  %v334_v41 = vld [vmem:[#allocation2 + $0x78] sm:$0xff]  ;;  %v920_v42 = vpack.c.bf16 %v424_v38, %v423_v37  ;;  %v425_v43 = vld [vmem:[#allocation5 + $0x60] sm:$0xff] }
  0x6f   : > { %909 = vmatpush3.bf16.msra.mxu1 %v908_v18  ;;  %v426_v44 = vld [vmem:[#allocation5 + $0x68] sm:$0xff]  ;;  %v902_v45 = vpack.c.bf16 %v334_v41, %v333_v40  ;;  %v318_v47 = vld [vmem:[%s317_s21] sm:$0xff]  ;;  %v427_v48 = vld [vmem:[#allocation5 + $0x70] sm:$0xff]  ;;  %p1113_p8 = pnand %p1112_p4, %p1507_p7  ;;  %s1115_s21 = sshll.u32 %s1191_s28, 4  ;;  %s1116_s21 = int_to_ptr.vmem [resolvable:$false] %s1115_s21 }
  0x70   : > { %888 = vmatpush3.bf16.msra.mxu0 %v887_v14  ;;  %910 = vmatprep.subr.bf16.mxu1 %v1188_v0  ;;  %v923_v46 = vpack.c.bf16 %v426_v44, %v425_v43  ;;  %v428_v49 = vld [vmem:[#allocation5 + $0x78] sm:$0xff]  ;;  %v507_v51 = vld [vmem:[#allocation7] sm:$0xff]  ;;  %v508_v52 = vld [vmem:[#allocation7 + $0x8] sm:$0xff]  ;;  %s1117_s22 = scalar_lea.vmem %s1116_s21, 256  ;;  %p1118_p13 = scmp.lt.s32.totalorder %s1440_s18, %s1116_s21 }
  0x71   : > { %889 = vmatprep.subr.bf16.mxu0 %v1188_v0  ;;  %v926_v50 = vpack.c.bf16 %v428_v49, %v427_v48  ;;  %v509_v53 = vld [vmem:[#allocation7 + $0x10] sm:$0xff]  ;;  %v929_v54 = vpack.c.bf16 %v508_v52, %v507_v51  ;;  %v510_v55 = vld [vmem:[#allocation7 + $0x18] sm:$0xff]  ;;  %v511_v57 = vld [vmem:[#allocation7 + $0x20] sm:$0xff]  ;;  %p1114_p11 = pneg %p1113_p8  ;;  %p1119_p1 = scmp.lt.s32.totalorder %s1117_s22, %s1111_s9 }
  0x72   : > { %v932_v56 = vpack.c.bf16 %v510_v55, %v509_v53  ;;  %v512_v58 = vld [vmem:[#allocation7 + $0x28] sm:$0xff]  ;;  %v513_v60 = vld [vmem:[#allocation7 + $0x30] sm:$0xff]  ;;  %v514_v61 = vld [vmem:[#allocation7 + $0x38] sm:$0xff] }
  0x73   : > { %912 = vmatpush3.bf16.msra.mxu1 %v911_v24  ;;  %v935_v59 = vpack.c.bf16 %v512_v58, %v511_v57  ;;  %v938_v62 = vpack.c.bf16 %v514_v61, %v513_v60  ;;  %v515_v63 = vld [vmem:[#allocation7 + $0x40] sm:$0xff]  ;;  %v517_v3 = vld [vmem:[#allocation7 + $0x50] sm:$0xff]  ;;  %v518_v4 = vld [vmem:[#allocation7 + $0x58] sm:$0xff]  ;;  %p1120_p6 = por %p1119_p1, %p1118_p13 }
  0x74   : > { %891 = vmatpush3.bf16.msra.mxu0 %v890_v21  ;;  %913 = vmatprep.subr.bf16.mxu1 %v1188_v0  ;;  %v944_v5 = vpack.c.bf16 %v518_v4, %v517_v3  ;;  %v519_v6 = vld [vmem:[#allocation7 + $0x60] sm:$0xff]  ;;  %v520_v7 = vld [vmem:[#allocation7 + $0x68] sm:$0xff]  ;;  %v521_v14 = vld [vmem:[#allocation7 + $0x70] sm:$0xff] }
  0x75   : > { %892 = vmatprep.subr.bf16.mxu0 %v1188_v0  ;;  %v947_v8 = vpack.c.bf16 %v520_v7, %v519_v6  ;;  %v717_v9 = vld [vmem:[%s1482_s2] ss:$0 sm:$0xff]  ;;  %v522_v15 = vld [vmem:[#allocation7 + $0x78] sm:$0xff]  ;;  %p1121_p9 = pnand %p1120_p6, %p1114_p11 }
  0x76   : > { %v950_v16 = vpack.c.bf16 %v522_v15, %v521_v14  ;;  %v718_v17 = vld [vmem:[%s1484_s4] ss:$0 sm:$0xff] }
  0x77   : > { %915 = vmatpush3.bf16.msra.mxu1 %v914_v30  ;;  %v719_v21 = vld [vmem:[%s1486_s6] ss:$0 sm:$0xff] }
  0x78   : > { %894 = vmatpush3.bf16.msra.mxu0 %v893_v27  ;;  %916 = vmatprep.subr.bf16.mxu1 %v1188_v0 }
  0x79   : > { %895 = vmatprep.subr.bf16.mxu0 %v1188_v0 }
  0x7b   : > { %918 = vmatpush3.bf16.msra.mxu1 %v917_v36 }
  0x7c   : > { %897 = vmatpush3.bf16.msra.mxu0 %v896_v33  ;;  %919 = vmatprep.subr.bf16.mxu1 %v1188_v0 }
  0x7d   : > { %898 = vmatprep.subr.bf16.mxu0 %v1188_v0 }
  0x7f   : > { %921 = vmatpush3.bf16.msra.mxu1 %v920_v42 }
  0x80   : > { %900 = vmatpush3.bf16.msra.mxu0 %v899_v39  ;;  %922 = vmatprep.subr.bf16.mxu1 %v1188_v0 }
  0x81   : > { %901 = vmatprep.subr.bf16.mxu0 %v1188_v0 }
  0x83   : > { %924 = vmatpush3.bf16.msra.mxu1 %v923_v46 }
  0x84   : > { %903 = vmatpush3.bf16.msra.mxu0 %v902_v45  ;;  %925 = vmatprep.subr.bf16.mxu1 %v1188_v0 }
  0x85   : > { %928 = vmatprep.subr.bf16.mxu0 %v1188_v0 }
  0x87   : > { %808 = vmatmul.mubr.f32.vlgmr.msra.gmra.mrb[0].mxu0 %v318_v47  ;;  %927 = vmatpush3.bf16.msra.mxu1 %v926_v50 }
  0x88   : > { %877 = vmatprep.mubr.msk.f32.mxu0 %vm1189_vm0, %v1190_v1  ;;  %930 = vmatpush3.bf16.msra.mxu0 %v929_v54  ;;  %v516_v1 = vld [vmem:[#allocation7 + $0x48] sm:$0xff] }
  0x89   : > { %931 = vmatprep.subr.bf16.mxu0 %v1188_v0  ;;  %v941_v2 = vpack.c.bf16 %v516_v1, %v515_v63 }
  0x8c   : > { %933 = vmatpush3.bf16.msra.mxu0 %v932_v56 }
  0x8d   : > { %934 = vmatprep.subr.bf16.mxu0 %v1188_v0 }
  0x90   : > { %936 = vmatpush3.bf16.msra.mxu0 %v935_v59 }
  0x91   : > { %937 = vmatprep.subr.bf16.mxu0 %v1188_v0 }
  0x94   : > { %939 = vmatpush3.bf16.msra.mxu0 %v938_v62 }
  0x95   : > { %940 = vmatprep.subr.bf16.mxu0 %v1188_v0 }
  0x98   : > { %942 = vmatpush3.bf16.msra.mxu0 %v941_v2 }
  0x99   : > { %943 = vmatprep.subr.bf16.mxu0 %v1188_v0 }
  0x9c   : > { %945 = vmatpush3.bf16.msra.mxu0 %v944_v5 }
  0x9d   : > { %946 = vmatprep.subr.bf16.mxu0 %v1188_v0 }
  0xa0   : > { %948 = vmatpush3.bf16.msra.mxu0 %v947_v8 }
  0xa1   : > { %949 = vmatprep.subr.bf16.mxu0 %v1188_v0 }
  0xa4   : > { %951 = vmatpush3.bf16.msra.mxu0 %v950_v16 }
 0x15a   : > { %v408_v10 = vpop.f32.mrb[0].mxu0 }
 0x15b   : > { %v409_v11 = vadd.f32 %v717_v9, %v408_v10  ;;  %v809_v12 = vpop.f32.mrb[1].mxu0 }
 0x15d   : > { %v412_v13 = vmax.f32 %v409_v11, 0.0 }
 0x15f   : > { %843 = vmatmul.mubr.f32.vlgmr.msra.gmra.mrb[0].mxu1 %v412_v13 }
 0x232   : > { %v502_v0 = vpop.f32.mrb[0].mxu1 }
 0x233   : > { %v503_v18 = vadd.f32 %v718_v17, %v502_v0  ;;  %v844_v19 = vpop.f32.mrb[1].mxu1 }
 0x235   : > { %v506_v20 = vmax.f32 %v503_v18, 0.0 }
 0x237   : > { %878 = vmatmul.mubr.f32.vlgmr.msra.gmra.mrb[2].mxu0 %v506_v20 }
 0x30a   : > { %v596_v22 = vpop.f32.mrb[2].mxu0 }
 0x30b   : > { %v597_v23 = vadd.f32 %v719_v21, %v596_v22  ;;  %v879_v24 = vpop.f32.mrb[3].mxu0 }
 0x30d   : > { %600 = vst [vmem:[%s313_s15] sm:$0xff] %v597_v23 }
 0x30e   : > { %1124 = shalt.err (!%p1121_p9)
}
 0x30f   : > { %s1125_s30 = scalar_lea.hbm %s1438_s16, 128  ;;  %s1129_s29 = scalar_lea.hbm %s1487_s7, 256 }
 0x310   : > { %p1126_p2 = scmp.ne.s32.totalorder %s1438_s16, %s1125_s30  ;;  %p1130_p5 = scmp.lt.u32.totalorder %s1438_s16, %s1487_s7 }
 0x311   : > { %p1131_p10 = scmp.lt.u32.totalorder %s1129_s29, %s1125_s30  ;;  %p1133_p4 = scmp.lt.u32.totalorder %s1125_s30, %s1438_s16 }
 0x312   : > { %p1127_p0 = pnand %p1126_p2, %p1507_p7 }
 0x313   : > { %p1132_p12 = por %p1131_p10, %p1130_p5 }
 0x314   : > { %p1128_p3 = pneg %p1127_p0 }
 0x315   : > { %p1134_p8 = por %p1133_p4, %p1132_p12 }
 0x317   : > { %p1135_p11 = pnand %p1134_p8, %p1128_p3 }
 0x319   : > { %1138 = shalt.err (!%p1135_p11)
}
 0x31a   : > { %964 = dma.vmem_to_hbm [thread:$0]  (%p1507_p7), %s1440_s18, 128, %s1438_s16, %s602_s20  }
 0x31b PF: > { %p986_p13 = scmp.ge.s32.totalorder %s1181_s27, 2  ;;  %s627_s17 = sand.u32 1, %s1169_s24  }
 0x31c   : > { %p1508_p1 = scmp.ne.s32.totalorder %s1498_s12, 0  ;;  %s628_s19 = scalar_lea.sflag [#allocation4], %s627_s17 }
 0x31e   : > { %p977_p6 = pnand %p986_p13, %p1508_p1 }
 0x320   : > { %1164 = dma.done.wait (!%p977_p6), %s628_s19, 128  }
 0x321   : > { %1166 = vsyncadd (!%p977_p6), %s628_s19, 4294967168  ;;  %s1509_s27 = sld [smem:[#allocation13_spill]]  ;;  %s1510_s15 = sld [smem:[#allocation12_spill]] }
 0x322   : > { %s1511_s26 = sld [smem:[#allocation14_spill]]  ;;  %s1512_s24 = smov %s1173_s25 }
 0x327   : > { %p19_p9 = scmp.ge.s32.totalorder %s1509_s27, 4   ;;  %s1513_s25 = smov %s1510_s15 }
 0x329   :  { %21 = sbr.rel (!%p19_p9) target bundleno = 5 (0x5), region = 96 }
 0x330   :  { %633 = vsyncpa [#allocation3], 1 }
 0x331   :  { %635 = vsyncpa [#allocation3 + $0x1], 1 }
 0x332   :  { %636 = vsyncpa [#allocation6], 1 }
 0x333   :  { %637 = vsyncpa [#allocation4], 1 }
 0x334   :  { %639 = vsyncpa [#allocation4 + $0x1], 1 }

</bundles_post_ra>
